<compile_context>
chip_gen: v7x
topology: tpu7x:2x2x1
jax: 0.10.0
libtpu: 0.0.40
codegen_flags: <defaults>
</compile_context>

<pallas_src>
import jax
import jax.numpy as jnp
from jax.experimental import pallas as pl
from jax.experimental.pallas import tpu as pltpu


def _round_up(x, m):
    return ((x + m - 1) // m) * m


def _flatten_head_kernel(x_ref, w_ref, b_ref, o_ref):
    # x_ref: [tm, nf_p] (bf16), w_ref: [nf_p, tn] (bf16),
    # b_ref: [1, tn] (f32), o_ref: [tm, tn] (out dtype)
    acc = jnp.dot(x_ref[...], w_ref[...], preferred_element_type=jnp.float32)
    # Dropout(head_dropout=0) at inference == identity.
    o_ref[...] = (acc + b_ref[...]).astype(o_ref.dtype)


def flatten_head(x, weight, bias, *, compute_dtype=jnp.bfloat16):
    """FlattenHead forward.

    x:      [B, n_vars, d_model, patch_num]
    weight: [nf, target_window]  (transposed vs torch Linear's [out, in])
    bias:   [target_window]
    returns [B, n_vars, target_window]
    """
    B, V, D, P = x.shape
    nf = D * P
    assert weight.shape[0] == nf, "weight must be [nf, target_window]"
    tw = weight.shape[1]
    M = B * V
    out_dtype = x.dtype

    # ---- layout plumbing in plain JAX (flatten + dtype + padding) ----------
    x2d = x.reshape(M, nf).astype(compute_dtype)
    w2d = weight.astype(compute_dtype)
    b2d = bias.astype(jnp.float32).reshape(1, tw)

    in_bytes = jnp.dtype(compute_dtype).itemsize
    out_bytes = jnp.dtype(out_dtype).itemsize

    # Lane-dense tiles: pad the contraction dim and the output dim to 128.
    nf_p = _round_up(nf, 128)
    tw_p = _round_up(tw, 128)
    tn = 256 if tw_p % 256 == 0 else 128

    # Pick the biggest row tile that fits a conservative VMEM budget
    # (safe across v5e / v6e / v7x scoped-VMEM defaults). Each pipelined
    # operand costs 2x its tile (double buffering).
    row_align = 16  # bf16 sublane packing
    m_ceiling = _round_up(M, row_align)
    vmem_budget = 24 * 1024 * 1024
    tm = row_align
    for cand in (1024, 512, 256, 128, 64, 32, 16):
        if cand > m_ceiling:
            continue
        usage = (2 * cand * nf_p * in_bytes      # X tile (double buffered)
                 + 2 * nf_p * tn * in_bytes      # W tile (double buffered)
                 + 2 * cand * tn * out_bytes     # O tile (double buffered)
                 + 2 * tn * 4)                   # bias tile
        if usage <= vmem_budget:
            tm = cand
            break
    M_p = _round_up(M, tm)
    # NOTE: for extremely large nf (>~16K) a K-tiled grid axis with a VMEM f32
    # accumulator (init on k==0, bias+cast on last k) would be the next step.

    x_pad = jnp.zeros((M_p, nf_p), compute_dtype).at[:M, :nf].set(x2d)
    w_pad = jnp.zeros((nf_p, tw_p), compute_dtype).at[:nf, :tw].set(w2d)
    b_pad = jnp.zeros((1, tw_p), jnp.float32).at[:, :tw].set(b2d)

    grid = (M_p // tm, tw_p // tn)

    cost = pl.CostEstimate(
        flops=2 * M_p * nf_p * tw_p,
        transcendentals=0,
        bytes_accessed=(M_p * nf_p * in_bytes
                        + nf_p * tw_p * in_bytes
                        + M_p * tw_p * out_bytes),
    )

    out2d = pl.pallas_call(
        _flatten_head_kernel,
        out_shape=jax.ShapeDtypeStruct((M_p, tw_p), out_dtype),
        grid_spec=pl.GridSpec(
            grid=grid,
            in_specs=[
                pl.BlockSpec((tm, nf_p), lambda i, j: (i, 0)),  # X: varies with rows only
                pl.BlockSpec((nf_p, tn), lambda i, j: (0, j)),  # W: resident across M tiles
                pl.BlockSpec((1, tn), lambda i, j: (0, j)),     # bias: resident across M tiles
            ],
            out_specs=pl.BlockSpec((tm, tn), lambda i, j: (i, j)),
        ),
        compiler_params=pltpu.CompilerParams(
            dimension_semantics=("parallel", "parallel"),
            vmem_limit_bytes=32 * 1024 * 1024,
        ),
        cost_estimate=cost,
    )(x_pad, w_pad, b_pad)

    return out2d[:M, :tw].reshape(B, V, tw)


if __name__ == "__main__":
    # Small shapes consistent with the module.
    B, n_vars, d_model, patch_num = 2, 4, 8, 4
    nf = d_model * patch_num          # 32
    target_window = 16

    key = jax.random.PRNGKey(0)
    kx, kw, kb = jax.random.split(key, 3)

    x = jax.random.normal(kx, (B, n_vars, d_model, patch_num), dtype=jnp.float32)
    # Deterministic synthetic params; weight kept as [nf, target_window].
    weight = jax.random.normal(kw, (nf, target_window), dtype=jnp.float32) * 0.05
    bias = jax.random.normal(kb, (target_window,), dtype=jnp.float32) * 0.05

    y = flatten_head(x, weight, bias)
    jax.block_until_ready(y)
    assert y.shape == (B, n_vars, target_window)

    # Reference with the same bf16-input / f32-accumulate contract as the kernel.
    xb = x.reshape(B, n_vars, nf).astype(jnp.bfloat16).astype(jnp.float32)
    wb = weight.astype(jnp.bfloat16).astype(jnp.float32)
    y_ref = xb @ wb + bias
    assert jnp.allclose(y, y_ref, atol=1e-3, rtol=1e-3)

    # Sanity vs full-precision math (bf16 input rounding tolerance).
    y_f32 = x.reshape(B, n_vars, nf) @ weight + bias
    assert jnp.allclose(y, y_f32, atol=5e-2, rtol=5e-2)

    print("KERNEL_OK")
</pallas_src>

<mosaic_0001>
module attributes {stable_mosaic.version = 11 : i64} {
  func.func @_flatten_head_kernel(%arg0: i32, %arg1: i32, %arg2: memref<16x128xbf16, #tpu.memory_space<vmem>>, %arg3: memref<128x128xbf16, #tpu.memory_space<vmem>>, %arg4: memref<1x128xf32, #tpu.memory_space<vmem>>, %arg5: memref<16x128xf32, #tpu.memory_space<vmem>>) attributes {dimension_semantics = [#tpu.dimension_semantics<parallel>, #tpu.dimension_semantics<parallel>], iteration_bounds = array<i64: 1, 1>, scalar_prefetch = 0 : i64, scratch_operands = 0 : i64, tpu.core_type = #tpu.core_type<tc>, window_params = [{transform_indices = @transform_0, window_bounds = array<i64: 16, 128>}, {transform_indices = @transform_1, window_bounds = array<i64: 128, 128>}, {transform_indices = @transform_2, window_bounds = array<i64: 1, 128>}, {transform_indices = @transform_3, window_bounds = array<i64: 16, 128>}]} {
    %c0 = arith.constant 0 : index
    %c0_0 = arith.constant 0 : index
    %0 = vector.load %arg2[%c0, %c0_0] : memref<16x128xbf16, #tpu.memory_space<vmem>>, vector<16x128xbf16>
    %c0_1 = arith.constant 0 : index
    %c0_2 = arith.constant 0 : index
    %1 = vector.load %arg3[%c0_1, %c0_2] : memref<128x128xbf16, #tpu.memory_space<vmem>>, vector<128x128xbf16>
    %cst = arith.constant dense<0.000000e+00> : vector<16x128xf32>
    %2 = tpu.matmul %0, %1, %cst {dimension_numbers = #tpu.dot_dimension_numbers<[1], [0], [0], [1], [0, 0, 1, 1], [], []>} : vector<16x128xbf16>, vector<128x128xbf16>, vector<16x128xf32> -> vector<16x128xf32>
    %c0_3 = arith.constant 0 : index
    %c0_4 = arith.constant 0 : index
    %3 = vector.load %arg4[%c0_3, %c0_4] : memref<1x128xf32, #tpu.memory_space<vmem>>, vector<1x128xf32>
    %4 = vector.broadcast %3 : vector<1x128xf32> to vector<16x128xf32>
    %5 = arith.addf %2, %4 : vector<16x128xf32>
    %c0_5 = arith.constant 0 : index
    %c0_6 = arith.constant 0 : index
    %6 = vector.load %arg5[%c0_5, %c0_6] : memref<16x128xf32, #tpu.memory_space<vmem>>, vector<16x128xf32>
    tpu.vector_store %arg5[%c0_5, %c0_6], %5 {strides = array<i32>} : memref<16x128xf32, #tpu.memory_space<vmem>>, vector<16x128xf32>,
    return
  }
  func.func @transform_0(%arg0: i32, %arg1: i32) -> (i32, i32) {
    %c0_i32 = arith.constant 0 : i32
    %c0_i32_0 = arith.constant 0 : i32
    return %arg0, %c0_i32 : i32, i32
  }
  func.func @transform_1(%arg0: i32, %arg1: i32) -> (i32, i32) {
    %c0_i32 = arith.constant 0 : i32
    %c0_i32_0 = arith.constant 0 : i32
    return %c0_i32, %arg1 : i32, i32
  }
  func.func @transform_2(%arg0: i32, %arg1: i32) -> (i32, i32) {
    %c0_i32 = arith.constant 0 : i32
    %c0_i32_0 = arith.constant 0 : i32
    return %c0_i32, %arg1 : i32, i32
  }
  func.func @transform_3(%arg0: i32, %arg1: i32) -> (i32, i32) {
    %c0_i32 = arith.constant 0 : i32
    return %arg0, %arg1 : i32, i32
  }
}

</mosaic_0001>

<bundles_post_ra>
// kernel: tpu_custom_call.1
= control target key start
LH: loop header
LB: loop body
LE: loop exit
PB: predicated region body
PF: predicated region fallthrough
CT: control target
= control target key end

     0   :  { %8 = vsyncpa [#allocation3], 0  ;;  %s381_s0 = inlined_call_operand.hbm [shape: bf16[16,128], index: 0, kind: input, shape index: {}]   ;;  %s382_s1 = inlined_call_operand.hbm [shape: bf16[128,128], index: 1, kind: input, shape index: {}]   ;;  %s383_s2 = inlined_call_operand.vmem [shape: f32[1,128], index: 2, kind: input, shape index: {}]   ;;  %s384_s3 = inlined_call_operand.hbm [shape: f32[16,128], index: 3, kind: output, shape index: {}]  }
   0x1   :  { %9 = vsyncpa [#allocation6], 0 }
   0x2   :  { %10 = vsyncpa [#allocation4], 0  ;;  %s313_s12 = smov [#allocation2]   ;;  %s241_s16 = scalar_lea.hbm %s381_s0, 128 }
   0x3   :  { %s16_s13 = sshll.u32 %s313_s12, 4  ;;  %p242_p0 = scmp.ne.s32.totalorder %s381_s0, %s241_s16  ;;  %s17_s13 = int_to_ptr.vmem [resolvable:$true] %s16_s13 }
   0x4   :  { %p245_p1 = scmp.lt.u32.totalorder %s241_s16, %s381_s0 }
   0x6   :  { %p247_p2 = pnand %p245_p1, %p242_p0 }
   0x8   :  { %250 = shalt.err (!%p247_p2)
}
   0x9   :  { %s251_s21 = scalar_lea.vmem %s17_s13, 128  ;;  %p256_p4 = scmp.lt.s32.totalorder %s17_s13, %s17_s13 }
   0xa   :  { %p252_p3 = scmp.ne.s32.totalorder %s17_s13, %s251_s21  ;;  %p257_p5 = scmp.lt.s32.totalorder %s251_s21, %s251_s21 }
   0xc   :  { %p258_p6 = por %p257_p5, %p256_p4 }
   0xe   :  { %p259_p7 = pnand %p258_p6, %p252_p3 }
  0x10   :  { %262 = shalt.err (!%p259_p7)
}
  0x11   :  { %s314_s22 = smov 64   ;;  %s315_s23 = smov 4  }
  0x12   :  { %22 = dma.hbm_to_vmem [thread:$0]  %s381_s0, 128, %s17_s13, [#allocation3], %s314_s22, %s314_s22, %s315_s23  }
  0x13   :  { %s316_s26 = smov [#allocation5]   ;;  %s263_s30 = scalar_lea.hbm %s382_s1, 1024 }
  0x14   :  { %s28_s27 = sshll.u32 %s316_s26, 4  ;;  %p264_p8 = scmp.ne.s32.totalorder %s382_s1, %s263_s30  ;;  %s29_s27 = int_to_ptr.vmem [resolvable:$true] %s28_s27 }
  0x15   :  { %p267_p9 = scmp.lt.u32.totalorder %s263_s30, %s382_s1 }
  0x17   :  { %p269_p10 = pnand %p267_p9, %p264_p8 }
  0x19   :  { %272 = shalt.err (!%p269_p10)
}
  0x1a   :  { %s273_s8 = scalar_lea.vmem %s29_s27, 1024  ;;  %p278_p12 = scmp.lt.s32.totalorder %s29_s27, %s29_s27 }
  0x1b   :  { %p274_p11 = scmp.ne.s32.totalorder %s29_s27, %s273_s8  ;;  %p279_p13 = scmp.lt.s32.totalorder %s273_s8, %s273_s8 }
  0x1d   :  { %p280_p0 = por %p279_p13, %p278_p12 }
  0x1f   :  { %p281_p1 = pnand %p280_p0, %p274_p11 }
  0x21   :  { %284 = shalt.err (!%p281_p1)
}
  0x22   :  { %34 = dma.hbm_to_vmem [thread:$0]  %s382_s1, 1024, %s29_s27, [#allocation6], %s314_s22, %s314_s22, %s315_s23  }
  0x23   :  { %307 = dma.done.wait [#allocation3], 128  }
  0x24   :  { %308 = vsyncadd [#allocation3], 4294967168 }
  0x25   :  { %309 = dma.done.wait [#allocation6], 1024  }
  0x26   :  { %310 = vsyncadd [#allocation6], 4294966272  ;;  %v317_v0 = vmov 0.0   ;;  %vm318_vm0 = vmmov 0   ;;  %v232_v1 = vld [vmem:[#allocation5] sm:$0xff]   ;;  %v233_v2 = vld [vmem:[#allocation5 + $0x8] sm:$0xff]  }
  0x27   :  { %203 = vmatprep.subr.bf16.mxu0 %v317_v0  ;;  %219 = vmatprep.mubr.msk.bf16.mxu0 %vm318_vm0, %v317_v0  ;;  %v234_v3 = vld [vmem:[#allocation5 + $0x10] sm:$0xff]   ;;  %v235_v4 = vld [vmem:[#allocation5 + $0x18] sm:$0xff]   ;;  %v236_v5 = vld [vmem:[#allocation5 + $0x20] sm:$0xff]   ;;  %s319_s11 = smov [#allocation7]  }
  0x28   :  { %204 = vmatpush3.bf16.msra.mxu0 %v232_v1  ;;  %v237_v6 = vld [vmem:[#allocation5 + $0x28] sm:$0xff]   ;;  %v238_v7 = vld [vmem:[#allocation5 + $0x30] sm:$0xff]   ;;  %v239_v8 = vld [vmem:[#allocation5 + $0x38] sm:$0xff]   ;;  %s171_s12 = sshll.u32 %s319_s11, 4  ;;  %s172_s12 = int_to_ptr.vmem [resolvable:$true] %s171_s12 }
  0x29   :  { %205 = vmatprep.subr.bf16.mxu0 %v317_v0  ;;  %v240_v9 = vld [vmem:[#allocation2] sm:$0xff]   ;;  %s285_s13 = scalar_lea.vmem %s172_s12, 256  ;;  %p290_p3 = scmp.lt.s32.totalorder %s172_s12, %s172_s12 }
  0x2a   :  { %v184_v10 = vld [vmem:[%s383_s2] ss:$0 sm:$0xff]  ;;  %p286_p2 = scmp.ne.s32.totalorder %s172_s12, %s285_s13  ;;  %p291_p4 = scmp.lt.s32.totalorder %s285_s13, %s285_s13 }
  0x2c   :  { %206 = vmatpush3.bf16.msra.mxu0 %v233_v2  ;;  %p292_p5 = por %p291_p4, %p290_p3 }
  0x2d   :  { %207 = vmatprep.subr.bf16.mxu0 %v317_v0 }
  0x2e   :  { %p293_p6 = pnand %p292_p5, %p286_p2 }
  0x30   :  { %208 = vmatpush3.bf16.msra.mxu0 %v234_v3 }
  0x31   :  { %209 = vmatprep.subr.bf16.mxu0 %v317_v0 }
  0x34   :  { %210 = vmatpush3.bf16.msra.mxu0 %v235_v4 }
  0x35   :  { %211 = vmatprep.subr.bf16.mxu0 %v317_v0 }
  0x38   :  { %212 = vmatpush3.bf16.msra.mxu0 %v236_v5 }
  0x39   :  { %213 = vmatprep.subr.bf16.mxu0 %v317_v0 }
  0x3c   :  { %214 = vmatpush3.bf16.msra.mxu0 %v237_v6 }
  0x3d   :  { %215 = vmatprep.subr.bf16.mxu0 %v317_v0 }
  0x40   :  { %216 = vmatpush3.bf16.msra.mxu0 %v238_v7 }
  0x41   :  { %217 = vmatprep.subr.bf16.mxu0 %v317_v0 }
  0x44   :  { %218 = vmatpush3.bf16.msra.mxu0 %v239_v8 }
  0x47   :  { %220 = vmatmul.mubr.bf16.vlgmr.msra.gmra.mrb[0].mxu0 %v240_v9 }
 0x11a   :  { %v157_v11 = vpop.f32.mrb[0].mxu0 }
 0x11b   :  { %v158_v12 = vadd.f32 %v184_v10, %v157_v11  ;;  %v221_v13 = vpop.f32.mrb[1].mxu0 }
 0x11c   :  { %v160_v14 = vpop.f32.mrb[2].mxu0 }
 0x11d   :  { %164 = vst [vmem:[#allocation7] sm:$0xff] %v158_v12  ;;  %v161_v15 = vadd.f32 %v184_v10, %v160_v14  ;;  %v222_v16 = vpop.f32.mrb[3].mxu0 }
 0x11f   :  { %165 = vst [vmem:[#allocation7 + $0x8] sm:$0xff] %v161_v15 }
 0x120   :  { %296 = shalt.err (!%p293_p6)
}
 0x121   :  { %s297_s15 = scalar_lea.hbm %s384_s3, 256 }
 0x122   :  { %p298_p7 = scmp.ne.s32.totalorder %s384_s3, %s297_s15  ;;  %p301_p8 = scmp.lt.u32.totalorder %s297_s15, %s384_s3 }
 0x124   :  { %p303_p9 = pnand %p301_p8, %p298_p7 }
 0x126   :  { %306 = shalt.err (!%p303_p9)
}
 0x127   :  { %s320_s20 = smov 128   ;;  %s321_s21 = smov 8  }
 0x128   :  { %177 = dma.vmem_to_hbm [thread:$0]  %s172_s12, 256, %s384_s3, [#allocation4], %s320_s20, %s320_s20, %s321_s21  }
 0x129   :  { %311 = dma.done.wait [#allocation4], 256  }
 0x12a   :  { %312 = vsyncadd [#allocation4], 4294967040 }
 0x12b   :  { %181 = vsyncpa [#allocation3], 1 }
 0x12c   :  { %182 = vsyncpa [#allocation6], 1 }
 0x12d   :  { %183 = vsyncpa [#allocation4], 1 }

</bundles_post_ra>
